<compile_context>
chip_gen: v6e
topology: v6e:2x2x1
jax: 0.10.0
libtpu: 0.0.40
codegen_flags: <defaults>
</compile_context>

<pallas_src>
import functools

import jax
import jax.numpy as jnp
from jax import lax
from jax.experimental import pallas as pl
from jax.experimental.pallas import tpu as pltpu

LANES = 128
MAX_BLOCK_ROWS = 2048  # 2048 * 128 * 4 B = 1 MiB per f32 input block


def _round_up(a, m):
    return ((a + m - 1) // m) * m


def _charbonnier_kernel(x_ref, y_ref, out_ref, *, eps, full_rows, rem, block_rows):
    # Per-tile cast to f32 (free-ish on the VPU; keeps HBM traffic at the
    # input dtype's width).
    diff = x_ref[...].astype(jnp.float32) - y_ref[...].astype(jnp.float32)
    val = jnp.sqrt(diff * diff + eps)

    # Mask out everything beyond the true element count n = full_rows*128+rem.
    # This covers both the <128-element lane tail and the garbage rows of a
    # partial trailing Pallas block (block larger than the remaining rows).
    row = lax.broadcasted_iota(jnp.int32, val.shape, 0) + pl.program_id(0) * block_rows
    lane = lax.broadcasted_iota(jnp.int32, val.shape, 1)
    valid = (row < full_rows) | ((row == full_rows) & (lane < rem))
    val = jnp.where(valid, val, 0.0)

    # Reduce the (block_rows, 128) tile to a single vreg-shaped (8, 128)
    # partial sum: pure elementwise vreg adds, no per-step cross-lane reduce.
    out_ref[...] = jnp.sum(val.reshape(-1, 8, LANES), axis=0)


def charbonnier_loss(x, y, epsilon=1e-06):
    """mean(sqrt((x - y)^2 + epsilon^2)) over all elements, via a Pallas kernel."""
    eps = float(epsilon) ** 2

    x_flat = jnp.ravel(x)  # keep original dtype; cast happens in-kernel
    y_flat = jnp.ravel(y)
    n = x_flat.shape[0]

    # View as lane-major (rows, 128) slabs. Only pad (<=127 zeros) when the
    # element count is not already lane-aligned; padded elements are masked
    # out inside the kernel, so no post-hoc correction is needed.
    if n % LANES:
        pad = LANES - n % LANES
        x_flat = jnp.pad(x_flat, (0, pad))
        y_flat = jnp.pad(y_flat, (0, pad))
    rows = x_flat.shape[0] // LANES
    x2d = x_flat.reshape(rows, LANES)
    y2d = y_flat.reshape(rows, LANES)

    # Sublane multiple depends on dtype packing: 8 for 4-byte, 16 for 2-byte,
    # 32 for 1-byte inputs.
    itemsize = min(jnp.dtype(x2d.dtype).itemsize, jnp.dtype(y2d.dtype).itemsize)
    sub_mult = max(8, 32 // max(1, itemsize))
    block_rows = min(MAX_BLOCK_ROWS, _round_up(rows, sub_mult))
    num_tiles = pl.cdiv(rows, block_rows)

    kernel = functools.partial(
        _charbonnier_kernel,
        eps=eps,
        full_rows=n // LANES,
        rem=n % LANES,
        block_rows=block_rows,
    )

    partials = pl.pallas_call(
        kernel,
        out_shape=jax.ShapeDtypeStruct((num_tiles * 8, LANES), jnp.float32),
        grid=(num_tiles,),
        in_specs=[
            pl.BlockSpec((block_rows, LANES), lambda i: (i, 0)),
            pl.BlockSpec((block_rows, LANES), lambda i: (i, 0)),
        ],
        out_specs=pl.BlockSpec((8, LANES), lambda i: (i, 0)),
        compiler_params=pltpu.CompilerParams(
            dimension_semantics=("parallel",),
        ),
    )(x2d, y2d)

    return jnp.sum(partials) / jnp.float32(n)


def charbonnier_loss_ref(x, y, epsilon=1e-06):
    diff = x.astype(jnp.float32) - y.astype(jnp.float32)
    return jnp.mean(jnp.sqrt(diff * diff + epsilon ** 2))


if __name__ == "__main__":
    key = jax.random.PRNGKey(0)
    kx, ky = jax.random.split(key)
    # NCHW, small shapes consistent with an image-restoration loss.
    x = jax.random.normal(kx, (2, 4, 16, 16), dtype=jnp.float32)
    y = jax.random.normal(ky, (2, 4, 16, 16), dtype=jnp.float32)

    out = charbonnier_loss(x, y)
    out = jax.block_until_ready(out)

    ref = charbonnier_loss_ref(x, y)
    assert jnp.allclose(out, ref, rtol=1e-5, atol=1e-6), (out, ref)
    print("KERNEL_OK")
</pallas_src>

<mosaic_0001>
module attributes {stable_mosaic.version = 11 : i64} {
  func.func @_charbonnier_kernel(%arg0: i32, %arg1: memref<16x128xf32, #tpu.memory_space<vmem>>, %arg2: memref<16x128xf32, #tpu.memory_space<vmem>>, %arg3: memref<8x128xf32, #tpu.memory_space<vmem>>) attributes {dimension_semantics = [#tpu.dimension_semantics<parallel>], iteration_bounds = array<i64: 1>, scalar_prefetch = 0 : i64, scratch_operands = 0 : i64, tpu.core_type = #tpu.core_type<tc>, window_params = [{transform_indices = @transform_0, window_bounds = array<i64: 16, 128>}, {transform_indices = @transform_1, window_bounds = array<i64: 16, 128>}, {transform_indices = @transform_2, window_bounds = array<i64: 8, 128>}]} {
    %c0 = arith.constant 0 : index
    %c0_0 = arith.constant 0 : index
    %0 = vector.load %arg1[%c0, %c0_0] : memref<16x128xf32, #tpu.memory_space<vmem>>, vector<16x128xf32>
    %c0_1 = arith.constant 0 : index
    %c0_2 = arith.constant 0 : index
    %1 = vector.load %arg2[%c0_1, %c0_2] : memref<16x128xf32, #tpu.memory_space<vmem>>, vector<16x128xf32>
    %2 = arith.subf %0, %1 : vector<16x128xf32>
    %3 = arith.mulf %2, %2 : vector<16x128xf32>
    %cst = arith.constant 9.99999996E-13 : f32
    %4 = vector.broadcast %cst : f32 to vector<16x128xf32>
    %5 = arith.addf %3, %4 : vector<16x128xf32>
    %6 = math.sqrt %5 : vector<16x128xf32>
    %7 = tpu.iota {dimensions = array<i32: 0>} : vector<16x128xi32>
    %c16_i32 = arith.constant 16 : i32
    %8 = arith.muli %arg0, %c16_i32 : i32
    %9 = vector.broadcast %8 : i32 to vector<16x128xi32>
    %10 = arith.addi %7, %9 : vector<16x128xi32>
    %11 = tpu.iota {dimensions = array<i32: 1>} : vector<16x128xi32>
    %c16_i32_3 = arith.constant 16 : i32
    %12 = vector.broadcast %c16_i32_3 : i32 to vector<16x128xi32>
    %13 = arith.cmpi slt, %10, %12 : vector<16x128xi32>
    %c16_i32_4 = arith.constant 16 : i32
    %14 = vector.broadcast %c16_i32_4 : i32 to vector<16x128xi32>
    %15 = arith.cmpi eq, %10, %14 : vector<16x128xi32>
    %c0_i32 = arith.constant 0 : i32
    %16 = vector.broadcast %c0_i32 : i32 to vector<16x128xi32>
    %17 = arith.cmpi slt, %11, %16 : vector<16x128xi32>
    %18 = arith.andi %15, %17 : vector<16x128xi1>
    %19 = arith.ori %13, %18 : vector<16x128xi1>
    %cst_5 = arith.constant 0.000000e+00 : f32
    %20 = vector.broadcast %cst_5 : f32 to vector<16x128xf32>
    %21 = arith.select %19, %6, %20 : vector<16x128xi1>, vector<16x128xf32>
    %22 = vector.shape_cast %21 : vector<16x128xf32> to vector<2x8x128xf32>
    %cst_6 = arith.constant dense<0.000000e+00> : vector<8x128xf32>
    %23 = vector.multi_reduction <add>, %22, %cst_6 [0] : vector<2x8x128xf32> to vector<8x128xf32>
    %c0_7 = arith.constant 0 : index
    %c0_8 = arith.constant 0 : index
    %24 = vector.load %arg3[%c0_7, %c0_8] : memref<8x128xf32, #tpu.memory_space<vmem>>, vector<8x128xf32>
    tpu.vector_store %arg3[%c0_7, %c0_8], %23 {strides = array<i32>} : memref<8x128xf32, #tpu.memory_space<vmem>>, vector<8x128xf32>,
    return
  }
  func.func @transform_0(%arg0: i32) -> (i32, i32) {
    %c0_i32 = arith.constant 0 : i32
    %c0_i32_0 = arith.constant 0 : i32
    return %arg0, %c0_i32 : i32, i32
  }
  func.func @transform_1(%arg0: i32) -> (i32, i32) {
    %c0_i32 = arith.constant 0 : i32
    %c0_i32_0 = arith.constant 0 : i32
    return %arg0, %c0_i32 : i32, i32
  }
  func.func @transform_2(%arg0: i32) -> (i32, i32) {
    %c0_i32 = arith.constant 0 : i32
    %c0_i32_0 = arith.constant 0 : i32
    return %arg0, %c0_i32 : i32, i32
  }
}

</mosaic_0001>

<bundles_post_ra>
// kernel: tpu_custom_call.1
= control target key start
LH: loop header
LB: loop body
LE: loop exit
PB: predicated region body
PF: predicated region fallthrough
CT: control target
= control target key end

     0   :  { %7 = vsyncpa [#allocation3], 0  ;;  %s206_s0 = inlined_call_operand.hbm [shape: f32[16,128], index: 0, kind: input, shape index: {}]   ;;  %s207_s1 = inlined_call_operand.hbm [shape: f32[16,128], index: 1, kind: input, shape index: {}]   ;;  %s208_s2 = inlined_call_operand.hbm [shape: f32[8,128], index: 2, kind: output, shape index: {}]  }
   0x1   :  { %8 = vsyncpa [#allocation6], 0 }
   0x2   :  { %9 = vsyncpa [#allocation4], 0  ;;  %s177_s9 = smov [#allocation2]  }
   0x3   :  { %s15_s10 = sshll.u32 %s177_s9, 4  ;;  %s16_s10 = int_to_ptr.vmem [resolvable:$true] %s15_s10 }
   0x4   :  { %s119_s11 = scalar_lea.vmem %s16_s10, 256  ;;  %p124_p1 = scmp.lt.s32.totalorder %s16_s10, %s16_s10 }
   0x5   :  { %p120_p0 = scmp.ne.s32.totalorder %s16_s10, %s119_s11  ;;  %p125_p2 = scmp.lt.s32.totalorder %s119_s11, %s119_s11 }
   0x7   :  { %p126_p3 = por %p125_p2, %p124_p1 }
   0x9   :  { %p127_p4 = pnand %p126_p3, %p120_p0 }
   0xb   :  { %130 = shalt.err (!%p127_p4)
}
   0xc   :  { %s178_s12 = smov 128   ;;  %s179_s13 = smov 8  }
   0xd   :  { %21 = dma.hbm_to_vmem [thread:$0]  %s206_s0, 256, %s16_s10, [#allocation3], %s178_s12, %s178_s12, %s179_s13  }
   0xe   :  { %s180_s16 = smov [#allocation5]  }
   0xf   :  { %s27_s17 = sshll.u32 %s180_s16, 4  ;;  %s28_s17 = int_to_ptr.vmem [resolvable:$true] %s27_s17 }
  0x10   :  { %s139_s18 = scalar_lea.vmem %s28_s17, 256  ;;  %p144_p6 = scmp.lt.s32.totalorder %s28_s17, %s28_s17 }
  0x11   :  { %p140_p5 = scmp.ne.s32.totalorder %s28_s17, %s139_s18  ;;  %p145_p7 = scmp.lt.s32.totalorder %s139_s18, %s139_s18 }
  0x13   :  { %p146_p8 = por %p145_p7, %p144_p6 }
  0x15   :  { %p147_p9 = pnand %p146_p8, %p140_p5 }
  0x17   :  { %150 = shalt.err (!%p147_p9)
}
  0x18   :  { %33 = dma.hbm_to_vmem [thread:$0]  %s207_s1, 256, %s28_s17, [#allocation6], %s178_s12, %s178_s12, %s179_s13  }
  0x19   :  { %171 = dma.done.wait [#allocation3], 256  }
  0x1a   :  { %172 = vsyncadd [#allocation3], 4294967040 }
  0x1b   :  { %173 = dma.done.wait [#allocation6], 256  }
  0x1c   :  { %174 = vsyncadd [#allocation6], 4294967040  ;;  %v40_v0 = vld [vmem:[#allocation2] sm:$0xff]  ;;  %v41_v1 = vld [vmem:[#allocation2 + $0x8] sm:$0xff]  ;;  %s181_s0 = smov [#allocation7]  }
  0x1d   :  { %v42_v2 = vld [vmem:[#allocation5] sm:$0xff]  ;;  %v43_v3 = vld [vmem:[#allocation5 + $0x8] sm:$0xff]  ;;  %s92_s1 = sshll.u32 %s181_s0, 4  ;;  %s93_s1 = int_to_ptr.vmem [resolvable:$true] %s92_s1 }
  0x1e   :  { %v44_v4 = vsub.f32 %v40_v0, %v42_v2  ;;  %v45_v5 = vsub.f32 %v41_v1, %v43_v3  ;;  %s151_s21 = scalar_lea.vmem %s93_s1, 128  ;;  %p156_p11 = scmp.lt.s32.totalorder %s93_s1, %s93_s1 }
  0x1f   :  { %p152_p10 = scmp.ne.s32.totalorder %s93_s1, %s151_s21  ;;  %p157_p12 = scmp.lt.s32.totalorder %s151_s21, %s151_s21 }
  0x20   :  { %v46_v6 = vmul.f32 %v44_v4, %v44_v4  ;;  %v47_v7 = vmul.f32 %v45_v5, %v45_v5 }
  0x21   :  { %p158_p13 = por %p157_p12, %p156_p11 }
  0x22   :  { %v48_v8 = vadd.f32 1e-12, %v46_v6  ;;  %v49_v9 = vadd.f32 1e-12, %v47_v7 }
  0x23   :  { %p159_p0 = pnand %p158_p13, %p152_p10 }
  0x24   :  { %107 = vrsqrt.f32 %v48_v8  ;;  %vm52_vm0 = vcmp.eq.f32.partialorder %v48_v8, inf  ;;  %v55_v11 = vand.u32 2147483648, %v48_v8  ;;  %vm54_vm1 = vcmp.eq.f32.partialorder %v48_v8, 0.0 }
  0x25   :  { %109 = vrsqrt.f32 %v49_v9  ;;  %vm59_vm2 = vcmp.eq.f32.partialorder %v49_v9, inf  ;;  %v62_v14 = vand.u32 2147483648, %v49_v9  ;;  %vm61_vm3 = vcmp.eq.f32.partialorder %v49_v9, 0.0 }
  0x31   :  { %v108_v10 = vpop.eup %107 }
  0x32   :  { %v110_v12 = vpop.eup %109  ;;  %v51_v13 = vmul.f32 %v108_v10, %v48_v8 }
  0x33   :  { %v58_v15 = vmul.f32 %v110_v12, %v49_v9 }
  0x34   :  { %v53_v16 = vsel %vm52_vm0, %v48_v8, %v51_v13 }
  0x35   :  { %v56_v17 = vsel %vm54_vm1, %v55_v11, %v53_v16  ;;  %v60_v18 = vsel %vm59_vm2, %v49_v9, %v58_v15 }
  0x36   :  { %v63_v19 = vsel %vm61_vm3, %v62_v14, %v60_v18 }
  0x37   :  { %v84_v20 = vadd.f32 %v63_v19, %v56_v17 }
  0x39   :  { %85 = vst [vmem:[#allocation7] sm:$0xff] %v84_v20 }
  0x3a   :  { %162 = shalt.err (!%p159_p0)
}
  0x3b   :  { %95 = dma.vmem_to_hbm [thread:$0]  %s93_s1, 128, %s208_s2, [#allocation4]  }
  0x3c   :  { %175 = dma.done.wait [#allocation4], 128  }
  0x3d   :  { %176 = vsyncadd [#allocation4], 4294967168 }
  0x3e   :  { %99 = vsyncpa [#allocation3], 1 }
  0x3f   :  { %100 = vsyncpa [#allocation6], 1 }
  0x40   :  { %101 = vsyncpa [#allocation4], 1 }

</bundles_post_ra>
